<compile_context>
chip_gen: v7x
topology: tpu7x:2x2x1
jax: 0.10.0
libtpu: 0.0.40
codegen_flags: <defaults>
</compile_context>

<pallas_src>
import math

import jax
import jax.numpy as jnp
from jax.experimental import pallas as pl
from jax.experimental.pallas import tpu as pltpu

_LANE = 128


def _drop_path_kernel(scale_ref, x_ref, o_ref):
    """scale_ref: (TR, 1) per-row scale in x.dtype ({0, 1/keep_prob});
    x_ref/o_ref: (TR, 128) data rows."""
    o_ref[...] = x_ref[...] * scale_ref[...]


def drop_path(x, drop_prob: float = 0.0, training: bool = False, *, rng_key=None):
    """Pallas implementation of DropPath.forward (per-sample stochastic depth)."""
    if drop_prob == 0.0 or not training:
        return x

    keep_prob = 1.0 - float(drop_prob)
    if rng_key is None:
        rng_key = jax.random.PRNGKey(0)

    orig_shape = x.shape
    B = x.shape[0]
    L = int(math.prod(x.shape[1:]))
    itemsize = jnp.dtype(x.dtype).itemsize

    # Per-sample scale, pre-folded with 1/keep_prob and cast to x.dtype so the
    # in-kernel multiply does not promote (keeps the store path full-width).
    mask = jax.random.bernoulli(rng_key, p=keep_prob, shape=(B,))
    scale = (mask.astype(jnp.float32) * (1.0 / keep_prob)).astype(x.dtype)

    # Lane-dense layout: pad per-sample features to a multiple of 128 lanes and
    # view the whole batch as (B*R, 128) rows (full sublane density).
    Lp = pl.cdiv(L, _LANE) * _LANE
    xf = x.reshape(B, L)
    if Lp != L:
        xf = jnp.pad(xf, ((0, 0), (0, Lp - L)))
    R = Lp // _LANE
    rows = xf.reshape(B * R, _LANE)
    scale_rows = jnp.repeat(scale, R)[:, None]          # (B*R, 1)

    # Row tile: multiple of 8 sublanes, <= ~1 MiB of data per block so that
    # double-buffered in+scale+out blocks stay well inside v7x's scoped VMEM.
    N = B * R
    max_rows = max(8, (((1 << 20) // (_LANE * itemsize)) // 8) * 8)
    TR = min(N, max_rows)
    TR = max(8, (TR // 8) * 8)
    Np = pl.cdiv(N, TR) * TR
    if Np != N:
        rows = jnp.pad(rows, ((0, Np - N), (0, 0)))
        scale_rows = jnp.pad(scale_rows, ((0, Np - N), (0, 0)))

    out = pl.pallas_call(
        _drop_path_kernel,
        out_shape=jax.ShapeDtypeStruct((Np, _LANE), x.dtype),
        grid=(Np // TR,),
        in_specs=[
            pl.BlockSpec((TR, 1), lambda i: (i, 0)),      # per-row scale
            pl.BlockSpec((TR, _LANE), lambda i: (i, 0)),  # data rows
        ],
        out_specs=pl.BlockSpec((TR, _LANE), lambda i: (i, 0)),
        compiler_params=pltpu.CompilerParams(
            dimension_semantics=("parallel",)),
        cost_estimate=pl.CostEstimate(
            flops=Np * _LANE,
            transcendentals=0,
            bytes_accessed=2 * Np * _LANE * itemsize + Np * itemsize),
    )(scale_rows, rows)

    out = out[:N].reshape(B, Lp)[:, :L].reshape(orig_shape)
    return out


class DropPath:
    """Mirror of the PyTorch module (no parameters; drop_prob is a hyperparam)."""

    def __init__(self, drop_prob=None):
        self.drop_prob = 0.0 if drop_prob is None else float(drop_prob)
        self.training = True

    def __call__(self, x, rng_key=None):
        return drop_path(x, self.drop_prob, self.training, rng_key=rng_key)


if __name__ == "__main__":
    key = jax.random.PRNGKey(0)
    B, C, H, W = 2, 4, 16, 16
    x = jax.random.normal(key, (B, C, H, W), dtype=jnp.float32)

    module = DropPath(drop_prob=0.2)
    module.training = True
    y = module(x, rng_key=jax.random.PRNGKey(1234))
    y = jax.block_until_ready(y)

    # Sanity: every sample is either exactly zeroed or scaled by 1/keep_prob.
    keep_prob = 1.0 - module.drop_prob
    ok = True
    for b in range(B):
        yb = y[b]
        is_dropped = bool(jnp.allclose(yb, 0.0))
        is_scaled = bool(jnp.allclose(yb, x[b] / keep_prob, rtol=1e-5, atol=1e-5))
        ok = ok and (is_dropped or is_scaled)

    # Eval / drop_prob==0 path is the identity.
    module.training = False
    y_eval = jax.block_until_ready(module(x))
    ok = ok and bool(jnp.array_equal(y_eval, x))

    if ok:
        print("KERNEL_OK")
    else:
        raise SystemExit("DropPath kernel output failed sanity check")
</pallas_src>

<mosaic_0001>
module attributes {stable_mosaic.version = 11 : i64} {
  func.func @_drop_path_kernel(%arg0: i32, %arg1: memref<16x1xf32, #tpu.memory_space<vmem>>, %arg2: memref<16x128xf32, #tpu.memory_space<vmem>>, %arg3: memref<16x128xf32, #tpu.memory_space<vmem>>) attributes {dimension_semantics = [#tpu.dimension_semantics<parallel>], iteration_bounds = array<i64: 1>, scalar_prefetch = 0 : i64, scratch_operands = 0 : i64, tpu.core_type = #tpu.core_type<tc>, window_params = [{transform_indices = @transform_0, window_bounds = array<i64: 16, 1>}, {transform_indices = @transform_1, window_bounds = array<i64: 16, 128>}, {transform_indices = @transform_2, window_bounds = array<i64: 16, 128>}]} {
    %c0 = arith.constant 0 : index
    %c0_0 = arith.constant 0 : index
    %0 = vector.load %arg2[%c0, %c0_0] : memref<16x128xf32, #tpu.memory_space<vmem>>, vector<16x128xf32>
    %c0_1 = arith.constant 0 : index
    %c0_2 = arith.constant 0 : index
    %1 = vector.load %arg1[%c0_1, %c0_2] : memref<16x1xf32, #tpu.memory_space<vmem>>, vector<16x1xf32>
    %2 = vector.broadcast %1 : vector<16x1xf32> to vector<16x128xf32>
    %3 = arith.mulf %0, %2 : vector<16x128xf32>
    %c0_3 = arith.constant 0 : index
    %c0_4 = arith.constant 0 : index
    %4 = vector.load %arg3[%c0_3, %c0_4] : memref<16x128xf32, #tpu.memory_space<vmem>>, vector<16x128xf32>
    tpu.vector_store %arg3[%c0_3, %c0_4], %3 {strides = array<i32>} : memref<16x128xf32, #tpu.memory_space<vmem>>, vector<16x128xf32>,
    return
  }
  func.func @transform_0(%arg0: i32) -> (i32, i32) {
    %c0_i32 = arith.constant 0 : i32
    %c0_i32_0 = arith.constant 0 : i32
    return %arg0, %c0_i32 : i32, i32
  }
  func.func @transform_1(%arg0: i32) -> (i32, i32) {
    %c0_i32 = arith.constant 0 : i32
    %c0_i32_0 = arith.constant 0 : i32
    return %arg0, %c0_i32 : i32, i32
  }
  func.func @transform_2(%arg0: i32) -> (i32, i32) {
    %c0_i32 = arith.constant 0 : i32
    %c0_i32_0 = arith.constant 0 : i32
    return %arg0, %c0_i32 : i32, i32
  }
}

</mosaic_0001>

<bundles_post_ra>
// kernel: tpu_custom_call.1
= control target key start
LH: loop header
LB: loop body
LE: loop exit
PB: predicated region body
PF: predicated region fallthrough
CT: control target
= control target key end

     0   :  { %s118_s0 = inlined_call_operand.vmem [shape: f32[16,1], index: 0, kind: input, shape index: {}]   ;;  %s119_s1 = inlined_call_operand.vmem [shape: f32[16,128], index: 1, kind: input, shape index: {}]   ;;  %s120_s2 = inlined_call_operand.hbm [shape: f32[16,128], index: 2, kind: output, shape index: {}]  }
   0x1   :  { %v14_v0 = vld [vmem:[%s118_s0] sm:$0xff] }
   0x2   :  { %7 = vsyncpa [#allocation3], 0  ;;  %v75_v1 = vmov 0   ;;  %v15_v2 = vld [vmem:[%s118_s0 + $0x8] sm:$0xff]  ;;  %v12_v3 = vld [vmem:[%s119_s1] sm:$0xff]  ;;  %s76_s15 = smov [#allocation2]  }
   0x3   :  { %50 = vset.pattern.permute.xlu0 %v75_v1  ;;  %s35_s16 = sshll.u32 %s76_s15, 4  ;;  %v13_v6 = vld [vmem:[%s119_s1 + $0x8] sm:$0xff]  ;;  %s36_s16 = int_to_ptr.vmem [resolvable:$true] %s35_s16 }
   0x4   :  { %18 = vperm.xlu0 %50, %v14_v0   ;;  %s51_s19 = scalar_lea.vmem %s36_s16, 256  ;;  %p56_p1 = scmp.lt.s32.totalorder %s36_s16, %s36_s16 }
   0x5   :  { %p52_p0 = scmp.ne.s32.totalorder %s36_s16, %s51_s19  ;;  %p57_p2 = scmp.lt.s32.totalorder %s51_s19, %s51_s19 }
   0x7   :  { %p58_p3 = por %p57_p2, %p56_p1 }
   0x8   :  { %23 = vperm.xlu0 %50, %v15_v2  }
   0x9   :  { %p59_p4 = pnand %p58_p3, %p52_p0 }
  0x83   :  { %v19_v4 = vpop.permute.xlu0 %18 }
  0x84   :  { %v26_v5 = vmul.f32 %v19_v4, %v12_v3 }
  0x86   :  { %28 = vst [vmem:[#allocation2] sm:$0xff] %v26_v5 }
  0x87   :  { %v24_v7 = vpop.permute.xlu0 %23 }
  0x88   :  { %v27_v8 = vmul.f32 %v24_v7, %v13_v6 }
  0x8a   :  { %29 = vst [vmem:[#allocation2 + $0x8] sm:$0xff] %v27_v8 }
  0x8b   :  { %62 = shalt.err (!%p59_p4)
}
  0x8c   :  { %s63_s21 = scalar_lea.hbm %s120_s2, 256 }
  0x8d   :  { %p64_p5 = scmp.ne.s32.totalorder %s120_s2, %s63_s21  ;;  %p67_p6 = scmp.lt.u32.totalorder %s63_s21, %s120_s2 }
  0x8f   :  { %p69_p7 = pnand %p67_p6, %p64_p5 }
  0x91   :  { %72 = shalt.err (!%p69_p7)
}
  0x92   :  { %s77_s25 = smov 128   ;;  %s78_s26 = smov 8  }
  0x93   :  { %41 = dma.vmem_to_hbm [thread:$0]  %s36_s16, 256, %s120_s2, [#allocation3], %s77_s25, %s77_s25, %s78_s26  }
  0x94   :  { %73 = dma.done.wait [#allocation3], 256  }
  0x95   :  { %74 = vsyncadd [#allocation3], 4294967040 }
  0x96   :  { %45 = vsyncpa [#allocation3], 1 }

</bundles_post_ra>
